<compile_context>
chip_gen: v7x
topology: tpu7x:2x2x1
jax: 0.10.0
libtpu: 0.0.40
codegen_flags: <defaults>
</compile_context>

<pallas_src>
import functools

import jax
import jax.numpy as jnp
from jax.experimental import pallas as pl
from jax.experimental.pallas import tpu as pltpu


def _pooling_kernel(emb_ref, mask_ref, out_ref,
                    max_acc, sum_acc, cnt_acc,
                    *, need_max, need_mean, need_sqrt):
    # emb_ref : (TB, TS, D)  native dtype block
    # mask_ref: (TB, TS, 1)  f32 block
    # out_ref : (TB, n_pooled, D) f32, written only on the last seq step
    k = pl.program_id(1)

    emb = emb_ref[...].astype(jnp.float32)        # (TB, TS, D)
    mask = mask_ref[...].astype(jnp.float32)      # (TB, TS, 1)

    @pl.when(k == 0)
    def _init():
        if need_max:
            max_acc[...] = jnp.full_like(max_acc, -jnp.inf)
        if need_mean or need_sqrt:
            sum_acc[...] = jnp.zeros_like(sum_acc)
            cnt_acc[...] = jnp.zeros_like(cnt_acc)

    if need_max:
        # masked positions -> -1e9 (matches the PyTorch reference exactly)
        tile_max = jnp.max(jnp.where(mask == 0.0, jnp.float32(-1e9), emb),
                           axis=1, keepdims=True)                 # (TB, 1, D)
        max_acc[...] = jnp.maximum(max_acc[...], tile_max)
    if need_mean or need_sqrt:
        sum_acc[...] += jnp.sum(emb * mask, axis=1, keepdims=True)  # (TB, 1, D)
        cnt_acc[...] += jnp.sum(mask, axis=1, keepdims=True)        # (TB, 1, 1)

    @pl.when(k == pl.num_programs(1) - 1)
    def _finalize():
        j = 0
        if need_max:
            out_ref[:, j:j + 1, :] = max_acc[...].astype(out_ref.dtype)
            j += 1
        if need_mean or need_sqrt:
            cnt = jnp.maximum(cnt_acc[...], jnp.float32(1e-9))      # (TB, 1, 1)
            if need_mean:
                out_ref[:, j:j + 1, :] = (sum_acc[...] / cnt).astype(out_ref.dtype)
                j += 1
            if need_sqrt:
                out_ref[:, j:j + 1, :] = (sum_acc[...] / jnp.sqrt(cnt)).astype(out_ref.dtype)


# Per double-buffered input buffer (embedding tile + lane-padded mask tile).
# Conservative so 2x(inputs) + output + scratch stays well inside v7x's 64 MiB.
_PER_BUFFER_BUDGET = 3 * 1024 * 1024


def _tile_bytes(tb, ts, d, emb_itemsize):
    # emb tile + mask tile; the (TS, 1) mask block lane-pads to 128 in VMEM.
    return tb * ts * (d * emb_itemsize + 128 * 4)


def _choose_tiles(B, S, D, emb_itemsize, tile_b, tile_s):
    if tile_s is None:
        if _tile_bytes(1, S, D, emb_itemsize) <= _PER_BUFFER_BUDGET:
            tile_s = S
        else:
            cands = [ts for ts in range(8, S, 8)
                     if S % ts == 0
                     and _tile_bytes(1, ts, D, emb_itemsize) <= _PER_BUFFER_BUDGET]
            tile_s = max(cands) if cands else S
    assert S % tile_s == 0, (S, tile_s)

    if tile_b is None:
        divisors = [tb for tb in range(1, B + 1) if B % tb == 0]
        fitting = [tb for tb in divisors
                   if _tile_bytes(tb, tile_s, D, emb_itemsize) <= _PER_BUFFER_BUDGET]
        tile_b = max(fitting) if fitting else 1
    assert B % tile_b == 0, (B, tile_b)
    return tile_b, tile_s


@functools.partial(
    jax.jit,
    static_argnames=("need_max", "need_mean", "need_sqrt", "tile_b", "tile_s"))
def _pooling_pallas(token_embeddings, attention_mask, *,
                    need_max, need_mean, need_sqrt, tile_b=None, tile_s=None):
    """Masked pooled reductions over the sequence axis.

    token_embeddings: [B, S, D] (any float dtype; cast to f32 on the VMEM tile)
    attention_mask  : [B, S]    (any dtype; cast to f32)
    Returns [B, n_pooled, D] f32 with the enabled modes in order
    (max, mean, mean-sqrt-len).
    """
    B, S, D = token_embeddings.shape
    n_pooled = int(need_max) + int(need_mean) + int(need_sqrt)
    assert n_pooled > 0

    mask3 = attention_mask.astype(jnp.float32)[:, :, None]   # [B, S, 1] (tiny)

    emb_itemsize = token_embeddings.dtype.itemsize
    TB, TS = _choose_tiles(B, S, D, emb_itemsize, tile_b, tile_s)

    kernel = functools.partial(
        _pooling_kernel,
        need_max=need_max, need_mean=need_mean, need_sqrt=need_sqrt)

    # VMEM sizing (double-buffered inputs + output + scratch) and cost hint.
    emb_buf = TB * TS * D * emb_itemsize
    mask_buf = TB * TS * 128 * 4
    out_buf = TB * 8 * D * 4
    scratch_buf = 2 * TB * 8 * D * 4 + TB * 8 * 128 * 4
    vmem_needed = 2 * (emb_buf + mask_buf) + 2 * out_buf + scratch_buf
    vmem_limit = int(min(64 * 2**20, max(2 * vmem_needed, 32 * 2**20)))

    cost = pl.CostEstimate(
        flops=3 * B * S * D,
        transcendentals=0,
        bytes_accessed=B * S * D * emb_itemsize + B * S * 4 + B * n_pooled * D * 4)

    return pl.pallas_call(
        kernel,
        out_shape=jax.ShapeDtypeStruct((B, n_pooled, D), jnp.float32),
        grid_spec=pltpu.PrefetchScalarGridSpec(
            num_scalar_prefetch=0,
            grid=(B // TB, S // TS),
            in_specs=[
                pl.BlockSpec((TB, TS, D), lambda b, k: (b, k, 0)),
                pl.BlockSpec((TB, TS, 1), lambda b, k: (b, k, 0)),
            ],
            out_specs=pl.BlockSpec((TB, n_pooled, D), lambda b, k: (b, 0, 0)),
            scratch_shapes=[
                pltpu.VMEM((TB, 1, D), jnp.float32),   # running max
                pltpu.VMEM((TB, 1, D), jnp.float32),   # running masked sum
                pltpu.VMEM((TB, 1, 1), jnp.float32),   # running mask count
            ],
        ),
        compiler_params=pltpu.CompilerParams(
            dimension_semantics=("parallel", "arbitrary"),
            vmem_limit_bytes=vmem_limit),
        cost_estimate=cost,
    )(token_embeddings, mask3)


class Pooling:
    """JAX/Pallas port of the PyTorch Pooling module (forward only)."""

    def __init__(self,
                 word_embedding_dimension: int,
                 pooling_mode_cls_token: bool = False,
                 pooling_mode_max_tokens: bool = False,
                 pooling_mode_mean_tokens: bool = True,
                 pooling_mode_mean_sqrt_len_tokens: bool = False):
        self.word_embedding_dimension = word_embedding_dimension
        self.pooling_mode_cls_token = pooling_mode_cls_token
        self.pooling_mode_max_tokens = pooling_mode_max_tokens
        self.pooling_mode_mean_tokens = pooling_mode_mean_tokens
        self.pooling_mode_mean_sqrt_len_tokens = pooling_mode_mean_sqrt_len_tokens
        mult = sum([pooling_mode_cls_token, pooling_mode_max_tokens,
                    pooling_mode_mean_tokens, pooling_mode_mean_sqrt_len_tokens])
        self.pooling_output_dimension = mult * word_embedding_dimension

    def get_sentence_embedding_dimension(self):
        return self.pooling_output_dimension

    def __call__(self, features):
        token_embeddings = features["token_embeddings"]      # [B, S, D] native dtype
        cls_token = features["cls_token_embeddings"]          # [B, D]
        attention_mask = features["attention_mask"]           # [B, S]
        B, S, D = token_embeddings.shape

        output_vectors = []
        if self.pooling_mode_cls_token:
            output_vectors.append(cls_token.astype(jnp.float32))

        need_max = self.pooling_mode_max_tokens
        need_mean = self.pooling_mode_mean_tokens
        need_sqrt = self.pooling_mode_mean_sqrt_len_tokens
        if need_max or need_mean or need_sqrt:
            # TODO(synk): optional 'token_weights_sum' denominator override is not
            # wired into the kernel; only the default mask-sum path is implemented.
            pooled = _pooling_pallas(
                token_embeddings,                # native dtype, cast in-kernel
                attention_mask,                  # [B, S]
                need_max=need_max, need_mean=need_mean, need_sqrt=need_sqrt)
            output_vectors.append(pooled.reshape(B, -1))      # order: max, mean, sqrt

        sentence_embedding = (output_vectors[0] if len(output_vectors) == 1
                              else jnp.concatenate(output_vectors, axis=1))
        out = dict(features)
        out["sentence_embedding"] = sentence_embedding
        return out


if __name__ == "__main__":
    key = jax.random.PRNGKey(0)

    # ---- test 1: default mean pooling, small shapes -------------------------
    B, S, D = 2, 8, 32
    k1, _ = jax.random.split(key)
    token_embeddings = jax.random.normal(k1, (B, S, D), dtype=jnp.float32)
    cls_token = token_embeddings[:, 0, :]
    lengths = jnp.array([5, 8], dtype=jnp.int32)
    attention_mask = (jnp.arange(S)[None, :] < lengths[:, None]).astype(jnp.float32)

    features = {
        "token_embeddings": token_embeddings,
        "cls_token_embeddings": cls_token,
        "attention_mask": attention_mask,
    }

    pooling = Pooling(word_embedding_dimension=D)   # default: mean-tokens
    emb = jax.block_until_ready(pooling(features)["sentence_embedding"])

    m = attention_mask[:, :, None]
    cnt = jnp.maximum(m.sum(1), 1e-9)
    ref_mean = (token_embeddings * m).sum(1) / cnt
    assert emb.shape == (B, D)
    assert jnp.allclose(emb, ref_mean, atol=1e-5, rtol=1e-5)

    # ---- test 2: cls + max + mean + mean-sqrt-len ---------------------------
    pooling_all = Pooling(word_embedding_dimension=D,
                          pooling_mode_cls_token=True,
                          pooling_mode_max_tokens=True,
                          pooling_mode_mean_tokens=True,
                          pooling_mode_mean_sqrt_len_tokens=True)
    emb_all = jax.block_until_ready(pooling_all(features)["sentence_embedding"])
    ref_max = jnp.where(m == 0.0, -1e9, token_embeddings).max(1)
    ref_sqrt = (token_embeddings * m).sum(1) / jnp.sqrt(cnt)
    ref_all = jnp.concatenate([cls_token, ref_max, ref_mean, ref_sqrt], axis=1)
    assert emb_all.shape == (B, 4 * D)
    assert jnp.allclose(emb_all, ref_all, atol=1e-5, rtol=1e-5)

    # ---- test 3: bf16 input + forced seq tiling (accumulator path) ----------
    B2, S2, D2 = 8, 256, 128
    k3, k4 = jax.random.split(key)
    tok2 = jax.random.normal(k3, (B2, S2, D2), dtype=jnp.float32).astype(jnp.bfloat16)
    lens2 = jax.random.randint(k4, (B2,), 1, S2 + 1)
    mask2 = (jnp.arange(S2)[None, :] < lens2[:, None]).astype(jnp.float32)
    pooled2 = jax.block_until_ready(_pooling_pallas(
        tok2, mask2, need_max=True, need_mean=True, need_sqrt=True,
        tile_b=8, tile_s=128))
    t2 = tok2.astype(jnp.float32)
    m2 = mask2[:, :, None]
    cnt2 = jnp.maximum(m2.sum(1), 1e-9)
    ref2 = jnp.concatenate([
        jnp.where(m2 == 0.0, -1e9, t2).max(1),
        (t2 * m2).sum(1) / cnt2,
        (t2 * m2).sum(1) / jnp.sqrt(cnt2)], axis=1)
    assert pooled2.shape == (B2, 3, D2)
    assert jnp.allclose(pooled2.reshape(B2, -1), ref2, atol=1e-4, rtol=1e-4)

    print("KERNEL_OK")
</pallas_src>

<mosaic_0001>
module attributes {stable_mosaic.version = 11 : i64} {
  func.func @_pooling_kernel(%arg0: i32, %arg1: i32, %arg2: memref<2x8x32xf32, #tpu.memory_space<vmem>>, %arg3: memref<2x8x1xf32, #tpu.memory_space<vmem>>, %arg4: memref<2x1x32xf32, #tpu.memory_space<vmem>>, %arg5: memref<2x1x32xf32, #tpu.memory_space<vmem>>, %arg6: memref<2x1x32xf32, #tpu.memory_space<vmem>>, %arg7: memref<2x1x1xf32, #tpu.memory_space<vmem>>) attributes {dimension_semantics = [#tpu.dimension_semantics<parallel>, #tpu.dimension_semantics<arbitrary>], iteration_bounds = array<i64: 1, 1>, scalar_prefetch = 0 : i64, scratch_operands = 3 : i64, tpu.core_type = #tpu.core_type<tc>, window_params = [{transform_indices = @transform_0, window_bounds = array<i64: 2, 8, 32>}, {transform_indices = @transform_1, window_bounds = array<i64: 2, 8, 1>}, {transform_indices = @transform_2, window_bounds = array<i64: 2, 1, 32>}]} {
    %c0 = arith.constant 0 : index
    %c0_0 = arith.constant 0 : index
    %c0_1 = arith.constant 0 : index
    %0 = vector.load %arg2[%c0, %c0_0, %c0_1] : memref<2x8x32xf32, #tpu.memory_space<vmem>>, vector<2x8x32xf32>
    %c0_2 = arith.constant 0 : index
    %c0_3 = arith.constant 0 : index
    %c0_4 = arith.constant 0 : index
    %1 = vector.load %arg3[%c0_2, %c0_3, %c0_4] : memref<2x8x1xf32, #tpu.memory_space<vmem>>, vector<2x8x1xf32>
    %c0_i32 = arith.constant 0 : i32
    %2 = arith.cmpi eq, %arg1, %c0_i32 : i32
    %3 = arith.extui %2 : i1 to i32
    %c0_i32_5 = arith.constant 0 : i32
    %4 = arith.cmpi ne, %3, %c0_i32_5 : i32
    scf.if %4 {
      %cst_21 = arith.constant 0.000000e+00 : f32
      %20 = vector.broadcast %cst_21 : f32 to vector<2x1x32xf32>
      %c0_22 = arith.constant 0 : index
      %c0_23 = arith.constant 0 : index
      %c0_24 = arith.constant 0 : index
      %21 = vector.load %arg6[%c0_22, %c0_23, %c0_24] : memref<2x1x32xf32, #tpu.memory_space<vmem>>, vector<2x1x32xf32>
      tpu.vector_store %arg6[%c0_22, %c0_23, %c0_24], %20 {strides = array<i32>} : memref<2x1x32xf32, #tpu.memory_space<vmem>>, vector<2x1x32xf32>,
      %cst_25 = arith.constant 0.000000e+00 : f32
      %22 = vector.broadcast %cst_25 : f32 to vector<2x1x1xf32>
      %c0_26 = arith.constant 0 : index
      %c0_27 = arith.constant 0 : index
      %c0_28 = arith.constant 0 : index
      %23 = vector.load %arg7[%c0_26, %c0_27, %c0_28] : memref<2x1x1xf32, #tpu.memory_space<vmem>>, vector<2x1x1xf32>
      tpu.vector_store %arg7[%c0_26, %c0_27, %c0_28], %22 {strides = array<i32>} : memref<2x1x1xf32, #tpu.memory_space<vmem>>, vector<2x1x1xf32>,
    } else {
    }
    %c0_6 = arith.constant 0 : index
    %c0_7 = arith.constant 0 : index
    %c0_8 = arith.constant 0 : index
    %5 = vector.load %arg6[%c0_6, %c0_7, %c0_8] : memref<2x1x32xf32, #tpu.memory_space<vmem>>, vector<2x1x32xf32>
    %6 = vector.broadcast %1 : vector<2x8x1xf32> to vector<2x8x32xf32>
    %7 = arith.mulf %0, %6 : vector<2x8x32xf32>
    %cst = arith.constant dense<0.000000e+00> : vector<2x32xf32>
    %8 = vector.multi_reduction <add>, %7, %cst [1] : vector<2x8x32xf32> to vector<2x32xf32>
    %9 = vector.shape_cast %8 : vector<2x32xf32> to vector<2x1x32xf32>
    %10 = arith.addf %5, %9 : vector<2x1x32xf32>
    %c0_9 = arith.constant 0 : index
    %c0_10 = arith.constant 0 : index
    %c0_11 = arith.constant 0 : index
    %11 = vector.load %arg6[%c0_9, %c0_10, %c0_11] : memref<2x1x32xf32, #tpu.memory_space<vmem>>, vector<2x1x32xf32>
    tpu.vector_store %arg6[%c0_9, %c0_10, %c0_11], %10 {strides = array<i32>} : memref<2x1x32xf32, #tpu.memory_space<vmem>>, vector<2x1x32xf32>,
    %c0_12 = arith.constant 0 : index
    %c0_13 = arith.constant 0 : index
    %c0_14 = arith.constant 0 : index
    %12 = vector.load %arg7[%c0_12, %c0_13, %c0_14] : memref<2x1x1xf32, #tpu.memory_space<vmem>>, vector<2x1x1xf32>
    %cst_15 = arith.constant dense<0.000000e+00> : vector<2x1xf32>
    %13 = vector.multi_reduction <add>, %1, %cst_15 [1] : vector<2x8x1xf32> to vector<2x1xf32>
    %14 = vector.shape_cast %13 : vector<2x1xf32> to vector<2x1x1xf32>
    %15 = arith.addf %12, %14 : vector<2x1x1xf32>
    %c0_16 = arith.constant 0 : index
    %c0_17 = arith.constant 0 : index
    %c0_18 = arith.constant 0 : index
    %16 = vector.load %arg7[%c0_16, %c0_17, %c0_18] : memref<2x1x1xf32, #tpu.memory_space<vmem>>, vector<2x1x1xf32>
    tpu.vector_store %arg7[%c0_16, %c0_17, %c0_18], %15 {strides = array<i32>} : memref<2x1x1xf32, #tpu.memory_space<vmem>>, vector<2x1x1xf32>,
    %c0_i32_19 = arith.constant 0 : i32
    %17 = arith.cmpi eq, %arg1, %c0_i32_19 : i32
    %18 = arith.extui %17 : i1 to i32
    %c0_i32_20 = arith.constant 0 : i32
    %19 = arith.cmpi ne, %18, %c0_i32_20 : i32
    scf.if %19 {
      %c0_21 = arith.constant 0 : index
      %c0_22 = arith.constant 0 : index
      %c0_23 = arith.constant 0 : index
      %20 = vector.load %arg7[%c0_21, %c0_22, %c0_23] : memref<2x1x1xf32, #tpu.memory_space<vmem>>, vector<2x1x1xf32>
      %cst_24 = arith.constant 9.99999971E-10 : f32
      %21 = vector.broadcast %cst_24 : f32 to vector<2x1x1xf32>
      %22 = arith.maximumf %20, %21 : vector<2x1x1xf32>
      %c0_25 = arith.constant 0 : index
      %c0_26 = arith.constant 0 : index
      %c0_27 = arith.constant 0 : index
      %23 = vector.load %arg6[%c0_25, %c0_26, %c0_27] : memref<2x1x32xf32, #tpu.memory_space<vmem>>, vector<2x1x32xf32>
      %24 = vector.broadcast %22 : vector<2x1x1xf32> to vector<2x1x32xf32>
      %25 = arith.divf %23, %24 : vector<2x1x32xf32>
      %c0_28 = arith.constant 0 : index
      %c0_29 = arith.constant 0 : index
      %c0_30 = arith.constant 0 : index
      %26 = vector.load %arg4[%c0_28, %c0_29, %c0_30] : memref<2x1x32xf32, #tpu.memory_space<vmem>>, vector<2x1x32xf32>
      tpu.vector_store %arg4[%c0_28, %c0_29, %c0_30], %25 {strides = array<i32>} : memref<2x1x32xf32, #tpu.memory_space<vmem>>, vector<2x1x32xf32>,
    } else {
    }
    return
  }
  func.func @transform_0(%arg0: i32, %arg1: i32) -> (i32, i32, i32) {
    %c0_i32 = arith.constant 0 : i32
    %c0_i32_0 = arith.constant 0 : i32
    return %arg0, %arg1, %c0_i32 : i32, i32, i32
  }
  func.func @transform_1(%arg0: i32, %arg1: i32) -> (i32, i32, i32) {
    %c0_i32 = arith.constant 0 : i32
    %c0_i32_0 = arith.constant 0 : i32
    return %arg0, %arg1, %c0_i32 : i32, i32, i32
  }
  func.func @transform_2(%arg0: i32, %arg1: i32) -> (i32, i32, i32) {
    %c0_i32 = arith.constant 0 : i32
    %c0_i32_0 = arith.constant 0 : i32
    %c0_i32_1 = arith.constant 0 : i32
    return %arg0, %c0_i32, %c0_i32_0 : i32, i32, i32
  }
}

</mosaic_0001>

<bundles_post_ra>
// kernel: _pooling_pallas.1
= control target key start
LH: loop header
LB: loop body
LE: loop exit
PB: predicated region body
PF: predicated region fallthrough
CT: control target
= control target key end

     0   :  { %vm23_vm0 = vcmask 0   ;;  %vm62_vm1 = vcmask 7168   ;;  %v166_v2 = vmov 0   ;;  %v167_v3 = vmov 0.0   ;;  %s220_s0 = inlined_call_operand.vmem [shape: f32[2,8,32], index: 0, kind: input, shape index: {}]   ;;  %s221_s1 = inlined_call_operand.vmem [shape: f32[2,8,1], index: 1, kind: input, shape index: {}]   ;;  %s222_s2 = inlined_call_operand.hbm [shape: f32[2,1,32], index: 2, kind: output, shape index: {}]  }
   0x1   :  { %v14_v0 = vld [vmem:[%s221_s1] sm:$0xff]  ;;  %v15_v1 = vld [vmem:[%s221_s1 + $0x8] sm:$0xff]  ;;  %136 = vset.pattern.permute.xlu0 %v166_v2  ;;  %24 = vst.msk [vmem:[#allocation4] sm:$0x1] %vm23_vm0, %v167_v3  ;;  %25 = vst.msk [vmem:[#allocation4 + $0x1] sm:$0x1] %vm23_vm0, %v167_v3  ;;  %137 = vset.pattern.permute.xlu1 %v166_v2 }
   0x2   :  { %v63_v4 = vsel %vm62_vm1, %v14_v0, 0.0  ;;  %v70_v5 = vsel %vm62_vm1, %v15_v1, 0.0  ;;  %vm20_vm2 = vcmask 253952   ;;  %30 = vperm.xlu0 %136, %v14_v0  }
   0x3   :  { %v64_v6 = vrot.slane %v63_v4, 4  ;;  %v71_v7 = vrot.slane %v70_v5, 4  ;;  %21 = vst.msk [vmem:[#allocation3] sm:$0x1] %vm20_vm2, %v167_v3  ;;  %22 = vst.msk [vmem:[#allocation3 + $0x1] sm:$0x1] %vm20_vm2, %v167_v3 }
   0x4   :  { %7 = vsyncpa [#allocation6], 0  ;;  %v12_v26 = vld [vmem:[%s220_s0] sm:$0xff]  ;;  %vm40_vm3 = vcmask 261120   ;;  %v13_v29 = vld [vmem:[%s220_s0 + $0x8] sm:$0xff]  ;;  %v96_v43 = vlaneseq  ;;  %s168_s0 = smov [#allocation5]  }
   0x5   :  { %v65_v8 = vadd.f32 %v64_v6, %v63_v4  ;;  %v72_v9 = vadd.f32 %v71_v7, %v70_v5  ;;  %s120_s16 = sshll.u32 %s168_s0, 4  ;;  %s121_s16 = int_to_ptr.vmem [resolvable:$true] %s120_s16 }
   0x6   :  { %35 = vperm.xlu0 %136, %v15_v1   ;;  %v97_v49 = vshrl.u32 %v96_v43, 7  ;;  %s142_s17 = scalar_lea.vmem %s121_s16, 32  ;;  %p147_p1 = scmp.lt.s32.totalorder %s121_s16, %s121_s16 }
   0x7   :  { %v66_v10 = vrot.slane %v65_v8, 2  ;;  %v73_v11 = vrot.slane %v72_v9, 2  ;;  %p143_p0 = scmp.ne.s32.totalorder %s121_s16, %s142_s17  ;;  %p148_p2 = scmp.lt.s32.totalorder %s142_s17, %s142_s17 }
   0x8   :  { %v60_v16 = vld [vmem:[#allocation4] sm:$0x1]  ;;  %v61_v17 = vld [vmem:[#allocation4 + $0x1] sm:$0x1]  ;;  %v98_v52 = vsub.s32 0, %v97_v49 }
   0x9   :  { %v67_v12 = vadd.f32 %v66_v10, %v65_v8  ;;  %v74_v13 = vadd.f32 %v73_v11, %v72_v9  ;;  %p149_p3 = por %p148_p2, %p147_p1 }
   0xa   :  { %v26_v42 = vld [vmem:[#allocation3] sm:$0x1]  ;;  %v27_v48 = vld [vmem:[#allocation3 + $0x1] sm:$0x1] }
   0xb   :  { %v68_v14 = vrot.slane %v67_v12, 1  ;;  %v75_v15 = vrot.slane %v74_v13, 1  ;;  %p150_p4 = pnand %p149_p3, %p143_p0 }
   0xd   :  { %v69_v18 = vadd.f32 %v68_v14, %v67_v12  ;;  %v76_v19 = vadd.f32 %v75_v15, %v74_v13 }
   0xf   :  { %v77_v20 = vadd.f32 %v69_v18, %v60_v16  ;;  %v78_v21 = vadd.f32 %v76_v19, %v61_v17 }
  0x11   :  { %80 = vst.msk [vmem:[#allocation4] sm:$0x1] %vm23_vm0, %v77_v20  ;;  %81 = vst.msk [vmem:[#allocation4 + $0x1] sm:$0x1] %vm23_vm0, %v78_v21 }
  0x18   :  { %v85_v22 = vld [vmem:[#allocation4] sm:$0x1]  ;;  %v86_v23 = vld [vmem:[#allocation4 + $0x1] sm:$0x1] }
  0x19   :  { %v87_v24 = vmax.f32 %v85_v22, 1e-09  ;;  %v88_v25 = vmax.f32 %v86_v23, 1e-09 }
  0x1b   :  { %93 = vperm.xlu1 %137, %v87_v24  }
  0x1f   :  { %102 = vperm.xlu1 %137, %v88_v25  }
  0x81   :  { %v31_v27 = vpop.permute.xlu0 %30 }
  0x82   :  { %v38_v28 = vmul.f32 %v31_v27, %v12_v26 }
  0x84   :  { %v41_v30 = vsel %vm40_vm3, %v38_v28, 0.0 }
  0x85   :  { %v42_v31 = vrot.slane %v41_v30, 4  ;;  %v36_v32 = vpop.permute.xlu0 %35 }
  0x86   :  { %v39_v33 = vmul.f32 %v36_v32, %v13_v29 }
  0x87   :  { %v43_v34 = vadd.f32 %v42_v31, %v41_v30 }
  0x88   :  { %v48_v35 = vsel %vm40_vm3, %v39_v33, 0.0 }
  0x89   :  { %v44_v36 = vrot.slane %v43_v34, 2  ;;  %v49_v37 = vrot.slane %v48_v35, 4 }
  0x8b   :  { %v45_v38 = vadd.f32 %v44_v36, %v43_v34  ;;  %v50_v39 = vadd.f32 %v49_v37, %v48_v35 }
  0x8d   :  { %v46_v40 = vrot.slane %v45_v38, 1  ;;  %v51_v41 = vrot.slane %v50_v39, 2 }
  0x8f   :  { %v47_v44 = vadd.f32 %v46_v40, %v45_v38  ;;  %v52_v45 = vadd.f32 %v51_v41, %v50_v39 }
  0x91   :  { %v55_v46 = vadd.f32 %v47_v44, %v26_v42  ;;  %v53_v47 = vrot.slane %v52_v45, 1 }
  0x93   :  { %58 = vst.msk [vmem:[#allocation3] sm:$0x1] %vm20_vm2, %v55_v46  ;;  %v54_v50 = vadd.f32 %v53_v47, %v52_v45 }
  0x95   :  { %v56_v51 = vadd.f32 %v54_v50, %v27_v48 }
  0x97   :  { %59 = vst.msk [vmem:[#allocation3 + $0x1] sm:$0x1] %vm20_vm2, %v56_v51 }
  0x9a   :  { %v94_v53 = vpop.permute.xlu1 %93  ;;  %v89_v58 = vld [vmem:[#allocation3] sm:$0x1] }
  0x9b   :  { %v99_v54 = vrot.slane %v94_v53, %v98_v52 }
  0x9d   :  { %138 = vrcp.f32 %v99_v54 }
  0x9e   :  { %v103_v55 = vpop.permute.xlu1 %102  ;;  %v90_v61 = vld [vmem:[#allocation3 + $0x1] sm:$0x1] }
  0x9f   :  { %v108_v56 = vrot.slane %v103_v55, %v98_v52 }
  0xa1   :  { %140 = vrcp.f32 %v108_v56 }
  0xa7   :  { %v139_v57 = vpop.eup %138 }
  0xa8   :  { %v110_v59 = vmul.f32 %v139_v57, %v89_v58 }
  0xaa   :  { %113 = vst.msk [vmem:[#allocation5] sm:$0x1] %vm20_vm2, %v110_v59 }
  0xab   :  { %v141_v60 = vpop.eup %140 }
  0xac   :  { %v112_v62 = vmul.f32 %v141_v60, %v90_v61 }
  0xae   :  { %114 = vst.msk [vmem:[#allocation5 + $0x1] sm:$0x1] %vm20_vm2, %v112_v62 }
  0xaf   :  { %153 = shalt.err (!%p150_p4)
}
  0xb0   :  { %s154_s20 = scalar_lea.hbm %s222_s2, 32 }
  0xb1   :  { %p155_p5 = scmp.ne.s32.totalorder %s222_s2, %s154_s20  ;;  %p158_p6 = scmp.lt.u32.totalorder %s154_s20, %s222_s2 }
  0xb3   :  { %p160_p7 = pnand %p158_p6, %p155_p5 }
  0xb5   :  { %163 = shalt.err (!%p160_p7)
}
  0xb6   :  { %s169_s25 = smov 16   ;;  %s170_s26 = smov 1  }
  0xb7   :  { %126 = dma.vmem_to_hbm [thread:$0]  %s121_s16, 32, %s222_s2, [#allocation6], %s169_s25, %s169_s25, %s170_s26  }
  0xb8   :  { %164 = dma.done.wait [#allocation6], 32  }
  0xb9   :  { %165 = vsyncadd [#allocation6], 4294967264 }
  0xba   :  { %130 = vsyncpa [#allocation6], 1 }

</bundles_post_ra>
